<compile_context>
chip_gen: v5e
topology: v5e:2x2
jax: 0.10.0
libtpu: 0.0.40
codegen_flags: <defaults>
</compile_context>

<pallas_src>
import functools

import jax
import jax.numpy as jnp
from jax.experimental import pallas as pl
from jax.experimental.pallas import tpu as pltpu


def _round_up(x, m):
    return (x + m - 1) // m * m


def _pad2(a, rows, cols):
    if rows == 0 and cols == 0:
        return a
    return jnp.pad(a, ((0, rows), (0, cols)))


def _sigmoid(x):
    # sigmoid(x) == 0.5 * tanh(0.5 * x) + 0.5  (exact identity).
    # tanh is a single EUP push; the exp + divide form is ~2 pushes and the
    # EUP slot is the next binding resource once DMA traffic is fixed.
    return 0.5 * jnp.tanh(0.5 * x) + 0.5


def _softplus(x, beta):
    # Matches torch.nn.functional.softplus(x, beta=beta, threshold=20):
    # x where beta*x > 20, else log1p(exp(beta*x)) / beta.
    # Both branches are evaluated; exp overflow is discarded by the where.
    bx = beta * x
    return jnp.where(bx > 20.0, x, jnp.log1p(jnp.exp(bx)) / beta)


def _ctlstm_kernel(x_ref, h_ref, c_ref, cbar_ref, wx_ref, wh_ref, b_ref,
                   cell_ref, cellbar_ref, do_ref, *, beta):
    """One batch tile of the CTLSTM cell.

    x_ref, h_ref     : (BM, H)     activations (dtype == weight dtype)
    c_ref, cbar_ref  : (BM, Hp)    previous cell / cell_bar (f32, lane-padded)
    wx_ref, wh_ref   : (H, 7*Hp)   gate-padded weights (resident across grid)
    b_ref            : (1, 7*Hp)   gate-padded bias (f32)
    cell_ref, cellbar_ref : (BM, Hp)  aliased in place with c_ref / cbar_ref
    do_ref           : (BM, 2*Hp)  fused slab [ gate_decay | gate_output ]
    """
    hp = cell_ref.shape[-1]          # lane-aligned per-gate width (mult of 128)

    # Two K=H MXU matmuls with f32 accumulation (no wrapper-side concat).
    z = (jnp.dot(x_ref[...], wx_ref[...], preferred_element_type=jnp.float32)
         + jnp.dot(h_ref[...], wh_ref[...], preferred_element_type=jnp.float32)
         + b_ref[...])

    # Gate order in z: 0 input, 1 forget, 2 output, 3 pre_c,
    #                  4 input_bar, 5 forget_bar, 6 decay.
    # Store decay / output gate as soon as they are ready: one lane-dense
    # output slab, shorter live ranges for the remaining gate temporaries.
    do_ref[:, 0:hp] = _softplus(z[:, 6 * hp:7 * hp], beta).astype(do_ref.dtype)
    do_ref[:, hp:2 * hp] = _sigmoid(z[:, 2 * hp:3 * hp]).astype(do_ref.dtype)

    gate_pre_c = jnp.tanh(z[:, 3 * hp:4 * hp])
    cell_ref[...] = (_sigmoid(z[:, 1 * hp:2 * hp]) * c_ref[...]
                     + _sigmoid(z[:, 0 * hp:1 * hp]) * gate_pre_c)
    cellbar_ref[...] = (_sigmoid(z[:, 5 * hp:6 * hp]) * cbar_ref[...]
                        + _sigmoid(z[:, 4 * hp:5 * hp]) * gate_pre_c)


def prepare_ctlstm_params(weight, bias, hidden_dim, param_dtype=jnp.float32):
    """Per-model (NOT per-timestep) weight layout preparation.

    weight: (7H, 2H), bias: (7H,)  (torch nn.Linear convention).
    Returns (w_x, w_h, b_fused):
      w_x, w_h : (H, 7*Hp), each gate's H columns zero-padded to Hp=ceil128(H)
      b_fused  : (1, 7*Hp) float32
    NOTE: for H < 128 the per-gate lane padding inflates weight/output bytes
    by Hp/H; acceptable for this demo, revisit (sublane gate packing) for
    tiny H in a bandwidth-critical recurrence.
    With param_dtype=bf16, activations are also cast to bf16 at HBM (see the
    wrappers), so expect ~1e-2 relative error vs the f32 reference.
    """
    hd = hidden_dim
    hp = _round_up(hd, 128)
    assert weight.shape == (7 * hd, 2 * hd) and bias.shape == (7 * hd,)
    # nn.Linear: out = [x, h] @ W.T + b  ->  x @ W.T[:H] + h @ W.T[H:]
    w_t = weight.T.reshape(2 * hd, 7, hd)                       # (2H, 7, H)
    w_t = jnp.pad(w_t, ((0, 0), (0, 0), (0, hp - hd)))          # gate -> Hp
    w_t = w_t.reshape(2 * hd, 7 * hp).astype(param_dtype)
    w_x, w_h = w_t[:hd], w_t[hd:]
    b_fused = jnp.pad(bias.reshape(7, hd), ((0, 0), (0, hp - hd)))
    b_fused = b_fused.reshape(1, 7 * hp).astype(jnp.float32)
    return w_x, w_h, b_fused


def pad_ctlstm_state(cell, cell_bar, hidden_dim, batch_pad):
    """Lift (B, H) state into the persistent padded (Bpad, Hp) layout ONCE
    before the recurrence; strip once at the end with state[:B, :H]."""
    hp = _round_up(hidden_dim, 128)
    b = cell.shape[0]
    return (_pad2(cell.astype(jnp.float32), batch_pad - b, hp - hidden_dim),
            _pad2(cell_bar.astype(jnp.float32), batch_pad - b, hp - hidden_dim))


def _vmem_budget_bytes():
    """~75% of physical VMEM (128 MiB on v5e/v6e, 64 MiB per core on v7x)."""
    try:
        cap = int(pltpu.get_tpu_info().vmem_capacity_bytes)
        return max(32 * 1024 * 1024, cap * 3 // 4)
    except Exception:
        return 64 * 1024 * 1024    # conservative fallback, safe on all gens


def _pick_batch_tile(bpad, block_batch, sub):
    """Largest tile <= block_batch (multiple of `sub`) dividing bpad; prefers
    >= 2 grid steps so ("parallel",) can shard across v7x's 2 TensorCores."""
    assert bpad % sub == 0
    bm = max(sub, min(_round_up(block_batch, sub), bpad))
    if bm >= bpad and bpad >= 2 * sub:
        bm = max(sub, (bpad // 2) // sub * sub)
    while bpad % bm:
        bm -= sub
    return max(bm, sub)


def ctlstm_cell_forward_prepared(x, h, cell_pad, cell_bar_pad, w_x, w_h,
                                 b_fused, *, beta=1.0, block_batch=256,
                                 out_dtype=jnp.float32):
    """Pallas forward on pre-padded state and pre-prepared (split) params.

    x, h                 : (Bpad, H)   batch-padded activations (w_x.dtype)
    cell_pad, cell_bar_pad : (Bpad, Hp) f32 persistent padded state; updated
                           IN PLACE (input_output_aliases) across a recurrence.
    Returns (cell_pad', cell_bar_pad', decay_outgate_pad) where
    decay_outgate_pad is (Bpad, 2*Hp) = [ gate_decay | gate_output ].
    """
    bpad, hd = x.shape
    hp = b_fused.shape[-1] // 7
    assert cell_pad.shape == (bpad, hp) and cell_bar_pad.shape == (bpad, hp)
    assert w_x.shape == (hd, 7 * hp) and w_h.shape == (hd, 7 * hp)

    act_bytes = jnp.dtype(x.dtype).itemsize
    sub = 16 if act_bytes < 4 else 8          # bf16 packs 2 rows per sublane
    assert bpad % sub == 0, "pad batch to a multiple of the sublane packing"
    bm = _pick_batch_tile(bpad, block_batch, sub)
    nb = bpad // bm

    x_spec = pl.BlockSpec((bm, hd), lambda i: (i, 0))
    st_spec = pl.BlockSpec((bm, hp), lambda i: (i, 0))
    do_spec = pl.BlockSpec((bm, 2 * hp), lambda i: (i, 0))
    # Constant index_map -> weights/bias DMA'd once, resident across tiles.
    w_spec = pl.BlockSpec((hd, 7 * hp), lambda i: (0, 0))
    b_spec = pl.BlockSpec((1, 7 * hp), lambda i: (0, 0))

    out_shape = (jax.ShapeDtypeStruct((bpad, hp), jnp.float32),
                 jax.ShapeDtypeStruct((bpad, hp), jnp.float32),
                 jax.ShapeDtypeStruct((bpad, 2 * hp), out_dtype))

    w_bytes = (w_x.size + w_h.size) * jnp.dtype(w_x.dtype).itemsize
    out_itemsize = jnp.dtype(out_dtype).itemsize
    cost = pl.CostEstimate(
        flops=2 * bpad * (2 * hd) * 7 * hp,
        transcendentals=8 * bpad * hp,
        bytes_accessed=(w_bytes + b_fused.size * 4
                        + 2 * bpad * hd * act_bytes        # x, h
                        + 2 * bpad * hp * 4                # c, cbar in
                        + 2 * bpad * hp * 4                # cell, cellbar out
                        + bpad * 2 * hp * out_itemsize))   # decay|outgate out

    # Resident weights (+bias, conservatively double-buffered), double-buffered
    # activation/state/output tiles, z intermediate + gate temporaries.
    vmem_est = (2 * (w_bytes + 7 * hp * 4)
                + 2 * (2 * bm * hd * act_bytes + 2 * bm * hp * 4)
                + 2 * (2 * bm * hp * 4 + bm * 2 * hp * out_itemsize)
                + bm * 7 * hp * 4 + 4 * bm * hp * 4)
    vmem_limit = int(min(max(2 * vmem_est, 32 * 1024 * 1024),
                         _vmem_budget_bytes()))

    kernel = functools.partial(_ctlstm_kernel, beta=float(beta))
    return pl.pallas_call(
        kernel,
        out_shape=out_shape,
        grid=(nb,),
        in_specs=[x_spec, x_spec, st_spec, st_spec, w_spec, w_spec, b_spec],
        out_specs=(st_spec, st_spec, do_spec),
        input_output_aliases={2: 0, 3: 1},    # cell / cell_bar update in place
        compiler_params=pltpu.CompilerParams(
            dimension_semantics=("parallel",),
            vmem_limit_bytes=vmem_limit,
        ),
        cost_estimate=cost,
    )(x, h, cell_pad, cell_bar_pad, w_x, w_h, b_fused)


def ctlstm_cell_forward(rnn_input, hidden_t_i_minus, cell_t_i_minus,
                        cell_bar_im1, weight, bias, *, beta=1.0,
                        block_batch=256, param_dtype=jnp.float32):
    """One-shot wrapper matching CTLSTMCell.forward (returns (B, H) arrays).

    weight: (7H, 2H), bias: (7H,)  (torch nn.Linear convention).
    For a recurrence, call prepare_ctlstm_params() once, pad the state once
    with pad_ctlstm_state(), and call ctlstm_cell_forward_prepared() per
    timestep (state stays padded and updates in place; donate the state args
    at the jit boundary to avoid defensive copies).
    """
    b, hd = rnn_input.shape
    hp = _round_up(hd, 128)
    w_x, w_h, b_fused = prepare_ctlstm_params(weight, bias, hd, param_dtype)

    sub = 16 if jnp.dtype(param_dtype).itemsize < 4 else 8
    bpad = _round_up(b, sub)
    # Cast activations at the source so DMA only moves param_dtype bytes.
    x_p = _pad2(rnn_input.astype(param_dtype), bpad - b, 0)
    h_p = _pad2(hidden_t_i_minus.astype(param_dtype), bpad - b, 0)
    c_p, cb_p = pad_ctlstm_state(cell_t_i_minus, cell_bar_im1, hd, bpad)

    cell_p, cellbar_p, do_p = ctlstm_cell_forward_prepared(
        x_p, h_p, c_p, cb_p, w_x, w_h, b_fused,
        beta=beta, block_batch=block_batch)

    cell_i = cell_p[:b, :hd]
    cell_bar_i = cellbar_p[:b, :hd]
    gate_decay = do_p[:b, :hd]
    gate_output = do_p[:b, hp:hp + hd]
    return cell_i, cell_bar_i, gate_decay, gate_output


def ctlstm_cell_forward_ref(rnn_input, hidden, cell, cell_bar, weight, bias,
                            *, beta=1.0):
    """Pure-JAX reference mirroring the PyTorch code."""
    input_i = jnp.concatenate([rnn_input, hidden], axis=-1)
    out = input_i @ weight.T + bias
    gi, gf, go, gc, gib, gfb, gd = jnp.split(out, 7, axis=-1)
    gi, gf, go = jax.nn.sigmoid(gi), jax.nn.sigmoid(gf), jax.nn.sigmoid(go)
    gc = jnp.tanh(gc)
    gib, gfb = jax.nn.sigmoid(gib), jax.nn.sigmoid(gfb)
    gd = _softplus(gd, beta)
    cell_i = gf * cell + gi * gc
    cell_bar_i = gfb * cell_bar + gib * gc
    return cell_i, cell_bar_i, gd, go


if __name__ == "__main__":
    hidden_dim = 32
    batch = 16
    beta = 1.0

    key = jax.random.PRNGKey(0)
    k_x, k_h, k_c, k_cb, k_w, k_b = jax.random.split(key, 6)

    rnn_input = jax.random.normal(k_x, (batch, hidden_dim), jnp.float32)
    hidden_tm = jax.random.normal(k_h, (batch, hidden_dim), jnp.float32)
    cell_tm = jax.random.normal(k_c, (batch, hidden_dim), jnp.float32)
    cell_bar = jax.random.normal(k_cb, (batch, hidden_dim), jnp.float32)

    # nn.Linear(2H, 7H) default init: U(-1/sqrt(2H), 1/sqrt(2H))
    bound = 1.0 / jnp.sqrt(2.0 * hidden_dim)
    weight = jax.random.uniform(k_w, (7 * hidden_dim, 2 * hidden_dim),
                                jnp.float32, -bound, bound)
    bias = jax.random.uniform(k_b, (7 * hidden_dim,), jnp.float32,
                              -bound, bound)

    # ---- one-shot path (matches CTLSTMCell.forward) -------------------------
    fwd = jax.jit(functools.partial(ctlstm_cell_forward, beta=beta))
    outs = jax.block_until_ready(
        fwd(rnn_input, hidden_tm, cell_tm, cell_bar, weight, bias))
    refs = ctlstm_cell_forward_ref(rnn_input, hidden_tm, cell_tm, cell_bar,
                                   weight, bias, beta=beta)
    for got, exp in zip(outs, refs):
        assert got.shape == exp.shape
        assert jnp.allclose(got, exp, atol=1e-5, rtol=1e-5), \
            float(jnp.max(jnp.abs(got - exp)))

    # ---- recurrence path: params prepared once, state stays padded ----------
    w_x, w_h, b_fused = prepare_ctlstm_params(weight, bias, hidden_dim)
    hp = b_fused.shape[-1] // 7
    bpad = _round_up(batch, 8)
    x_p = _pad2(rnn_input, bpad - batch, 0)
    h_p = _pad2(hidden_tm, bpad - batch, 0)
    c_p, cb_p = pad_ctlstm_state(cell_tm, cell_bar, hidden_dim, bpad)

    step = jax.jit(functools.partial(ctlstm_cell_forward_prepared, beta=beta))
    c_ref_s, cb_ref_s = cell_tm, cell_bar
    for _ in range(3):
        c_p, cb_p, do_p = step(x_p, h_p, c_p, cb_p, w_x, w_h, b_fused)
        c_ref_s, cb_ref_s, gd_ref, go_ref = ctlstm_cell_forward_ref(
            rnn_input, hidden_tm, c_ref_s, cb_ref_s, weight, bias, beta=beta)
    c_p, cb_p, do_p = jax.block_until_ready((c_p, cb_p, do_p))
    assert jnp.allclose(c_p[:batch, :hidden_dim], c_ref_s, atol=1e-5, rtol=1e-5)
    assert jnp.allclose(cb_p[:batch, :hidden_dim], cb_ref_s, atol=1e-5, rtol=1e-5)
    assert jnp.allclose(do_p[:batch, :hidden_dim], gd_ref, atol=1e-5, rtol=1e-5)
    assert jnp.allclose(do_p[:batch, hp:hp + hidden_dim], go_ref,
                        atol=1e-5, rtol=1e-5)

    print("KERNEL_OK")
</pallas_src>

<mosaic_0001>
module attributes {stable_mosaic.version = 11 : i64} {
  func.func @_ctlstm_kernel(%arg0: i32, %arg1: memref<8x32xf32, #tpu.memory_space<vmem>>, %arg2: memref<8x32xf32, #tpu.memory_space<vmem>>, %arg3: memref<8x128xf32, #tpu.memory_space<vmem>>, %arg4: memref<8x128xf32, #tpu.memory_space<vmem>>, %arg5: memref<32x896xf32, #tpu.memory_space<vmem>>, %arg6: memref<32x896xf32, #tpu.memory_space<vmem>>, %arg7: memref<1x896xf32, #tpu.memory_space<vmem>>, %arg8: memref<8x128xf32, #tpu.memory_space<vmem>>, %arg9: memref<8x128xf32, #tpu.memory_space<vmem>>, %arg10: memref<8x256xf32, #tpu.memory_space<vmem>>) attributes {dimension_semantics = [#tpu.dimension_semantics<parallel>], iteration_bounds = array<i64: 2>, scalar_prefetch = 0 : i64, scratch_operands = 0 : i64, tpu.core_type = #tpu.core_type<tc>, window_params = [{transform_indices = @transform_0, window_bounds = array<i64: 8, 32>}, {transform_indices = @transform_1, window_bounds = array<i64: 8, 32>}, {transform_indices = @transform_2, window_bounds = array<i64: 8, 128>}, {transform_indices = @transform_3, window_bounds = array<i64: 8, 128>}, {pipeline_mode = #tpu.pipeline_mode<synchronous>, transform_indices = @transform_4, window_bounds = array<i64: 32, 896>}, {pipeline_mode = #tpu.pipeline_mode<synchronous>, transform_indices = @transform_5, window_bounds = array<i64: 32, 896>}, {pipeline_mode = #tpu.pipeline_mode<synchronous>, transform_indices = @transform_6, window_bounds = array<i64: 1, 896>}, {transform_indices = @transform_7, window_bounds = array<i64: 8, 128>}, {transform_indices = @transform_8, window_bounds = array<i64: 8, 128>}, {transform_indices = @transform_9, window_bounds = array<i64: 8, 256>}]} {
    %c0 = arith.constant 0 : index
    %c0_0 = arith.constant 0 : index
    %0 = vector.load %arg1[%c0, %c0_0] : memref<8x32xf32, #tpu.memory_space<vmem>>, vector<8x32xf32>
    %c0_1 = arith.constant 0 : index
    %c0_2 = arith.constant 0 : index
    %1 = vector.load %arg5[%c0_1, %c0_2] : memref<32x896xf32, #tpu.memory_space<vmem>>, vector<32x896xf32>
    %cst = arith.constant dense<0.000000e+00> : vector<8x896xf32>
    %2 = tpu.matmul %0, %1, %cst {dimension_numbers = #tpu.dot_dimension_numbers<[1], [0], [0], [1], [0, 0, 1, 1], [], []>} : vector<8x32xf32>, vector<32x896xf32>, vector<8x896xf32> -> vector<8x896xf32>
    %c0_3 = arith.constant 0 : index
    %c0_4 = arith.constant 0 : index
    %3 = vector.load %arg2[%c0_3, %c0_4] : memref<8x32xf32, #tpu.memory_space<vmem>>, vector<8x32xf32>
    %c0_5 = arith.constant 0 : index
    %c0_6 = arith.constant 0 : index
    %4 = vector.load %arg6[%c0_5, %c0_6] : memref<32x896xf32, #tpu.memory_space<vmem>>, vector<32x896xf32>
    %cst_7 = arith.constant dense<0.000000e+00> : vector<8x896xf32>
    %5 = tpu.matmul %3, %4, %cst_7 {dimension_numbers = #tpu.dot_dimension_numbers<[1], [0], [0], [1], [0, 0, 1, 1], [], []>} : vector<8x32xf32>, vector<32x896xf32>, vector<8x896xf32> -> vector<8x896xf32>
    %6 = arith.addf %2, %5 : vector<8x896xf32>
    %c0_8 = arith.constant 0 : index
    %c0_9 = arith.constant 0 : index
    %7 = vector.load %arg7[%c0_8, %c0_9] : memref<1x896xf32, #tpu.memory_space<vmem>>, vector<1x896xf32>
    %8 = vector.broadcast %7 : vector<1x896xf32> to vector<8x896xf32>
    %9 = arith.addf %6, %8 : vector<8x896xf32>
    %10 = vector.extract_strided_slice %9 {offsets = [0, 768], sizes = [8, 128], strides = [1, 1]} : vector<8x896xf32> to vector<8x128xf32>
    %cst_10 = arith.constant 1.000000e+00 : f32
    %11 = vector.broadcast %cst_10 : f32 to vector<8x128xf32>
    %12 = arith.mulf %11, %10 : vector<8x128xf32>
    %cst_11 = arith.constant 2.000000e+01 : f32
    %13 = vector.broadcast %cst_11 : f32 to vector<8x128xf32>
    %14 = arith.cmpf ogt, %12, %13 : vector<8x128xf32>
    %15 = math.exp %12 : vector<8x128xf32>
    %16 = math.log1p %15 : vector<8x128xf32>
    %cst_12 = arith.constant 1.000000e+00 : f32
    %17 = vector.broadcast %cst_12 : f32 to vector<8x128xf32>
    %18 = arith.divf %16, %17 : vector<8x128xf32>
    %19 = arith.select %14, %10, %18 : vector<8x128xi1>, vector<8x128xf32>
    %c0_13 = arith.constant 0 : index
    %c0_14 = arith.constant 0 : index
    %20 = vector.load %arg10[%c0_13, %c0_14] : memref<8x256xf32, #tpu.memory_space<vmem>>, vector<8x128xf32>
    tpu.vector_store %arg10[%c0_13, %c0_14], %19 {strides = array<i32>} : memref<8x256xf32, #tpu.memory_space<vmem>>, vector<8x128xf32>,
    %21 = vector.extract_strided_slice %9 {offsets = [0, 256], sizes = [8, 128], strides = [1, 1]} : vector<8x896xf32> to vector<8x128xf32>
    %cst_15 = arith.constant 5.000000e-01 : f32
    %22 = vector.broadcast %cst_15 : f32 to vector<8x128xf32>
    %23 = arith.mulf %22, %21 : vector<8x128xf32>
    %24 = math.tanh %23 : vector<8x128xf32>
    %cst_16 = arith.constant 5.000000e-01 : f32
    %25 = vector.broadcast %cst_16 : f32 to vector<8x128xf32>
    %26 = arith.mulf %25, %24 : vector<8x128xf32>
    %cst_17 = arith.constant 5.000000e-01 : f32
    %27 = vector.broadcast %cst_17 : f32 to vector<8x128xf32>
    %28 = arith.addf %26, %27 : vector<8x128xf32>
    %c0_18 = arith.constant 0 : index
    %c128 = arith.constant 128 : index
    %29 = vector.load %arg10[%c0_18, %c128] : memref<8x256xf32, #tpu.memory_space<vmem>>, vector<8x128xf32>
    tpu.vector_store %arg10[%c0_18, %c128], %28 {strides = array<i32>} : memref<8x256xf32, #tpu.memory_space<vmem>>, vector<8x128xf32>,
    %30 = vector.extract_strided_slice %9 {offsets = [0, 384], sizes = [8, 128], strides = [1, 1]} : vector<8x896xf32> to vector<8x128xf32>
    %31 = math.tanh %30 : vector<8x128xf32>
    %32 = vector.extract_strided_slice %9 {offsets = [0, 128], sizes = [8, 128], strides = [1, 1]} : vector<8x896xf32> to vector<8x128xf32>
    %cst_19 = arith.constant 5.000000e-01 : f32
    %33 = vector.broadcast %cst_19 : f32 to vector<8x128xf32>
    %34 = arith.mulf %33, %32 : vector<8x128xf32>
    %35 = math.tanh %34 : vector<8x128xf32>
    %cst_20 = arith.constant 5.000000e-01 : f32
    %36 = vector.broadcast %cst_20 : f32 to vector<8x128xf32>
    %37 = arith.mulf %36, %35 : vector<8x128xf32>
    %cst_21 = arith.constant 5.000000e-01 : f32
    %38 = vector.broadcast %cst_21 : f32 to vector<8x128xf32>
    %39 = arith.addf %37, %38 : vector<8x128xf32>
    %c0_22 = arith.constant 0 : index
    %c0_23 = arith.constant 0 : index
    %40 = vector.load %arg3[%c0_22, %c0_23] : memref<8x128xf32, #tpu.memory_space<vmem>>, vector<8x128xf32>
    %41 = arith.mulf %39, %40 : vector<8x128xf32>
    %42 = vector.extract_strided_slice %9 {offsets = [0, 0], sizes = [8, 128], strides = [1, 1]} : vector<8x896xf32> to vector<8x128xf32>
    %cst_24 = arith.constant 5.000000e-01 : f32
    %43 = vector.broadcast %cst_24 : f32 to vector<8x128xf32>
    %44 = arith.mulf %43, %42 : vector<8x128xf32>
    %45 = math.tanh %44 : vector<8x128xf32>
    %cst_25 = arith.constant 5.000000e-01 : f32
    %46 = vector.broadcast %cst_25 : f32 to vector<8x128xf32>
    %47 = arith.mulf %46, %45 : vector<8x128xf32>
    %cst_26 = arith.constant 5.000000e-01 : f32
    %48 = vector.broadcast %cst_26 : f32 to vector<8x128xf32>
    %49 = arith.addf %47, %48 : vector<8x128xf32>
    %50 = arith.mulf %49, %31 : vector<8x128xf32>
    %51 = arith.addf %41, %50 : vector<8x128xf32>
    %c0_27 = arith.constant 0 : index
    %c0_28 = arith.constant 0 : index
    %52 = vector.load %arg8[%c0_27, %c0_28] : memref<8x128xf32, #tpu.memory_space<vmem>>, vector<8x128xf32>
    tpu.vector_store %arg8[%c0_27, %c0_28], %51 {strides = array<i32>} : memref<8x128xf32, #tpu.memory_space<vmem>>, vector<8x128xf32>,
    %53 = vector.extract_strided_slice %9 {offsets = [0, 640], sizes = [8, 128], strides = [1, 1]} : vector<8x896xf32> to vector<8x128xf32>
    %cst_29 = arith.constant 5.000000e-01 : f32
    %54 = vector.broadcast %cst_29 : f32 to vector<8x128xf32>
    %55 = arith.mulf %54, %53 : vector<8x128xf32>
    %56 = math.tanh %55 : vector<8x128xf32>
    %cst_30 = arith.constant 5.000000e-01 : f32
    %57 = vector.broadcast %cst_30 : f32 to vector<8x128xf32>
    %58 = arith.mulf %57, %56 : vector<8x128xf32>
    %cst_31 = arith.constant 5.000000e-01 : f32
    %59 = vector.broadcast %cst_31 : f32 to vector<8x128xf32>
    %60 = arith.addf %58, %59 : vector<8x128xf32>
    %c0_32 = arith.constant 0 : index
    %c0_33 = arith.constant 0 : index
    %61 = vector.load %arg4[%c0_32, %c0_33] : memref<8x128xf32, #tpu.memory_space<vmem>>, vector<8x128xf32>
    %62 = arith.mulf %60, %61 : vector<8x128xf32>
    %63 = vector.extract_strided_slice %9 {offsets = [0, 512], sizes = [8, 128], strides = [1, 1]} : vector<8x896xf32> to vector<8x128xf32>
    %cst_34 = arith.constant 5.000000e-01 : f32
    %64 = vector.broadcast %cst_34 : f32 to vector<8x128xf32>
    %65 = arith.mulf %64, %63 : vector<8x128xf32>
    %66 = math.tanh %65 : vector<8x128xf32>
    %cst_35 = arith.constant 5.000000e-01 : f32
    %67 = vector.broadcast %cst_35 : f32 to vector<8x128xf32>
    %68 = arith.mulf %67, %66 : vector<8x128xf32>
    %cst_36 = arith.constant 5.000000e-01 : f32
    %69 = vector.broadcast %cst_36 : f32 to vector<8x128xf32>
    %70 = arith.addf %68, %69 : vector<8x128xf32>
    %71 = arith.mulf %70, %31 : vector<8x128xf32>
    %72 = arith.addf %62, %71 : vector<8x128xf32>
    %c0_37 = arith.constant 0 : index
    %c0_38 = arith.constant 0 : index
    %73 = vector.load %arg9[%c0_37, %c0_38] : memref<8x128xf32, #tpu.memory_space<vmem>>, vector<8x128xf32>
    tpu.vector_store %arg9[%c0_37, %c0_38], %72 {strides = array<i32>} : memref<8x128xf32, #tpu.memory_space<vmem>>, vector<8x128xf32>,
    return
  }
  func.func @transform_0(%arg0: i32) -> (i32, i32) {
    %c0_i32 = arith.constant 0 : i32
    %c0_i32_0 = arith.constant 0 : i32
    return %arg0, %c0_i32 : i32, i32
  }
  func.func @transform_1(%arg0: i32) -> (i32, i32) {
    %c0_i32 = arith.constant 0 : i32
    %c0_i32_0 = arith.constant 0 : i32
    return %arg0, %c0_i32 : i32, i32
  }
  func.func @transform_2(%arg0: i32) -> (i32, i32) {
    %c0_i32 = arith.constant 0 : i32
    %c0_i32_0 = arith.constant 0 : i32
    return %arg0, %c0_i32 : i32, i32
  }
  func.func @transform_3(%arg0: i32) -> (i32, i32) {
    %c0_i32 = arith.constant 0 : i32
    %c0_i32_0 = arith.constant 0 : i32
    return %arg0, %c0_i32 : i32, i32
  }
  func.func @transform_4(%arg0: i32) -> (i32, i32) {
    %c0_i32 = arith.constant 0 : i32
    %c0_i32_0 = arith.constant 0 : i32
    %c0_i32_1 = arith.constant 0 : i32
    return %c0_i32, %c0_i32_0 : i32, i32
  }
  func.func @transform_5(%arg0: i32) -> (i32, i32) {
    %c0_i32 = arith.constant 0 : i32
    %c0_i32_0 = arith.constant 0 : i32
    %c0_i32_1 = arith.constant 0 : i32
    return %c0_i32, %c0_i32_0 : i32, i32
  }
  func.func @transform_6(%arg0: i32) -> (i32, i32) {
    %c0_i32 = arith.constant 0 : i32
    %c0_i32_0 = arith.constant 0 : i32
    %c0_i32_1 = arith.constant 0 : i32
    return %c0_i32, %c0_i32_0 : i32, i32
  }
  func.func @transform_7(%arg0: i32) -> (i32, i32) {
    %c0_i32 = arith.constant 0 : i32
    %c0_i32_0 = arith.constant 0 : i32
    return %arg0, %c0_i32 : i32, i32
  }
  func.func @transform_8(%arg0: i32) -> (i32, i32) {
    %c0_i32 = arith.constant 0 : i32
    %c0_i32_0 = arith.constant 0 : i32
    return %arg0, %c0_i32 : i32, i32
  }
  func.func @transform_9(%arg0: i32) -> (i32, i32) {
    %c0_i32 = arith.constant 0 : i32
    %c0_i32_0 = arith.constant 0 : i32
    return %arg0, %c0_i32 : i32, i32
  }
}

</mosaic_0001>

<bundles_post_ra>
// kernel: ctlstm_cell_forward.1
= control target key start
LH: loop header
LB: loop body
LE: loop exit
PB: predicated region body
PF: predicated region fallthrough
CT: control target
= control target key end

     0   :  { %s1081_s30 = smov 0   ;;  %s1314_s0 = inlined_call_operand.vmem [shape: f32[16,32], index: 0, kind: input, shape index: {}]   ;;  %s1315_s1 = inlined_call_operand.vmem [shape: f32[16,32], index: 1, kind: input, shape index: {}]   ;;  %s1316_s2 = inlined_call_operand.vmem [shape: f32[16,128], index: 2, kind: input, shape index: {}, may-alias: {2,7}]   ;;  %s1317_s3 = inlined_call_operand.vmem [shape: f32[16,128], index: 3, kind: input, shape index: {}, may-alias: {3,8}]   ;;  %s1318_s4 = inlined_call_operand.vmem [shape: f32[32,896], index: 4, kind: input, shape index: {}]   ;;  %s1319_s5 = inlined_call_operand.vmem [shape: f32[32,896], index: 5, kind: input, shape index: {}]   ;;  %s1320_s6 = inlined_call_operand.vmem [shape: f32[1,896], index: 6, kind: input, shape index: {}]   ;;  %s1321_s7 = inlined_call_operand.vmem [shape: f32[16,128], index: 7, kind: output, shape index: {0}, may-alias: {2,7}]   ;;  %s1322_s8 = inlined_call_operand.vmem [shape: f32[16,128], index: 8, kind: output, shape index: {1}, may-alias: {3,8}]   ;;  %s1323_s9 = inlined_call_operand.vmem [shape: f32[16,256], index: 9, kind: output, shape index: {2}]  }
   0x1 LB: > { %s969_s10 = sadd.s32 4294967295, %s1029_s30   ;;  %p973_p0 = scmp.ge.s32.totalorder %s1029_s30, 1  ;;  %s1029_s30 = sphi %s1081_s30, %s20_s30  }
   0x2   : > { %p318_p1 = scmp.lt.s32.totalorder %s1029_s30, 3 }
   0x4   : > { %p319_p2 = pnand %p973_p0, %p318_p1 }
   0x5   : > { %p373_p3 = scmp.lt.s32.totalorder (!%p319_p2), %s969_s10, 1 }
   0x6   : > { %322 = sbr.rel (%p319_p2) target bundleno = 203 (0xcb), region = 48 }
   0xb   : > { %v453_v0 = vld [vmem:[%s1319_s5 + $0xa8] sm:$0xff]  ;;  %v454_v1 = vld [vmem:[%s1319_s5 + $0xb0] sm:$0xff]  ;;  %v455_v2 = vld [vmem:[%s1319_s5 + $0xb8] sm:$0xff]  ;;  %s1325_s10 = smov (!%p373_p3, %s969_s10), 1  ;;  %vm460_vm0 = vcmask 261120  }
   0xc   : > { %476 = vmatpush.msra.mxu0 %v453_v0  ;;  %496 = vmatpush.msra.mxu1 %v454_v1  ;;  %v456_v3 = vld [vmem:[%s1319_s5 + $0xc0] sm:$0xff]  ;;  %v446_v4 = vld [vmem:[%s1319_s5 + $0x70] sm:$0xff]  ;;  %v447_v5 = vld [vmem:[%s1319_s5 + $0x78] sm:$0xff]  ;;  %s1134_s20 = sshll.u32 %s1325_s10, 3  ;;  %s998_s26 = sshll.u32 %s1325_s10, 4 }
   0xd   : > { %516 = vmatpush.msra.mxu2 %v455_v2  ;;  %536 = vmatpush.msra.mxu3 %v456_v3  ;;  %v448_v6 = vld [vmem:[%s1319_s5 + $0x80] sm:$0xff]  ;;  %v449_v7 = vld [vmem:[%s1319_s5 + $0x88] sm:$0xff]  ;;  %v439_v8 = vld [vmem:[%s1319_s5 + $0x38] sm:$0xff]  ;;  %s380_s27 = scalar_lea.vmem %s1315_s1, %s1134_s20  ;;  %s376_s22 = scalar_lea.vmem %s1314_s0, %s1134_s20 }
   0xe   : > { %477 = vmatpush.msra.mxu0 %v446_v4  ;;  %497 = vmatpush.msra.mxu1 %v447_v5  ;;  %v440_v9 = vld [vmem:[%s1319_s5 + $0x40] sm:$0xff]  ;;  %v441_v10 = vld [vmem:[%s1319_s5 + $0x48] sm:$0xff]  ;;  %v442_v11 = vld [vmem:[%s1319_s5 + $0x50] sm:$0xff]  ;;  %s384_s25 = scalar_lea.vmem %s1316_s2, %s1134_s20  ;;  %s1295_s29 = scalar_lea.vmem %s1323_s9, %s998_s26 }
   0xf   : > { %517 = vmatpush.msra.mxu2 %v448_v6  ;;  %537 = vmatpush.msra.mxu3 %v449_v7  ;;  %v432_v12 = vld [vmem:[%s1319_s5] sm:$0xff]  ;;  %v433_v13 = vld [vmem:[%s1319_s5 + $0x8] sm:$0xff]  ;;  %v434_v14 = vld [vmem:[%s1319_s5 + $0x10] sm:$0xff]  ;;  %s392_s12 = scalar_lea.vmem %s1321_s7, %s1134_s20  ;;  %s388_s15 = scalar_lea.vmem %s1317_s3, %s1134_s20 }
  0x10   : > { %478 = vmatpush.msra.mxu0 %v439_v8  ;;  %498 = vmatpush.msra.mxu1 %v440_v9  ;;  %v435_v15 = vld [vmem:[%s1319_s5 + $0x18] sm:$0xff]  ;;  %v431_v16 = vld [vmem:[%s380_s27] sm:$0xff]  ;;  %v458_v17 = vld [vmem:[%s1319_s5 + $0xd0] sm:$0xff]  ;;  %s396_s18 = scalar_lea.vmem %s1322_s8, %s1134_s20 }
  0x11   : > { %518 = vmatpush.msra.mxu2 %v441_v10  ;;  %538 = vmatpush.msra.mxu3 %v442_v11  ;;  %v457_v18 = vld [vmem:[%s1319_s5 + $0xc8] sm:$0xff]  ;;  %v459_v19 = vld [vmem:[%s1319_s5 + $0xd8] sm:$0xff]  ;;  %v450_v22 = vld [vmem:[%s1319_s5 + $0x90] sm:$0xff] }
  0x12   : > { %479 = vmatpush.msra.mxu0 %v432_v12  ;;  %499 = vmatpush.msra.mxu1 %v433_v13  ;;  %v424_v20 = vld [vmem:[%s1318_s4 + $0xa8] sm:$0xff]  ;;  %v451_v21 = vld [vmem:[%s1319_s5 + $0x98] sm:$0xff]  ;;  %v452_v23 = vld [vmem:[%s1319_s5 + $0xa0] sm:$0xff] }
  0x13   : > { %519 = vmatpush.msra.mxu2 %v434_v14  ;;  %539 = vmatpush.msra.mxu3 %v435_v15  ;;  %v417_v24 = vld [vmem:[%s1318_s4 + $0x70] sm:$0xff]  ;;  %v444_v25 = vld [vmem:[%s1319_s5 + $0x60] sm:$0xff]  ;;  %v443_v26 = vld [vmem:[%s1319_s5 + $0x58] sm:$0xff] }
  0x14   : > { %982 = vmatmul.msk.f32.vlgmr.msra.gmra.mxu0 %vm460_vm0, %v431_v16  ;;  %983 = vmatmul.msk.f32.vlgmr.msra.gmra.mxu1 %vm460_vm0, %v431_v16  ;;  %v445_v27 = vld [vmem:[%s1319_s5 + $0x68] sm:$0xff]  ;;  %v410_v28 = vld [vmem:[%s1318_s4 + $0x38] sm:$0xff]  ;;  %v436_v30 = vld [vmem:[%s1319_s5 + $0x20] sm:$0xff] }
  0x15   : > { %984 = vmatmul.msk.f32.vlgmr.msra.gmra.mxu2 %vm460_vm0, %v431_v16  ;;  %985 = vmatmul.msk.f32.vlgmr.msra.gmra.mxu3 %vm460_vm0, %v431_v16  ;;  %v437_v29 = vld [vmem:[%s1319_s5 + $0x28] sm:$0xff]  ;;  %v438_v31 = vld [vmem:[%s1319_s5 + $0x30] sm:$0xff]  ;;  %v403_v32 = vld [vmem:[%s1318_s4] sm:$0xff] }
  0x16   : > { %576 = vmatpush.msrb.mxu1 %v458_v17  ;;  %556 = vmatpush.msrb.mxu0 %v457_v18  ;;  %v402_v33 = vld [vmem:[%s376_s22] sm:$0xff]  ;;  %v426_v34 = vld [vmem:[%s1318_s4 + $0xb8] sm:$0xff]  ;;  %v425_v35 = vld [vmem:[%s1318_s4 + $0xb0] sm:$0xff] }
  0x17   : > { %596 = vmatpush.msrb.mxu2 %v459_v19  ;;  %619 = vmatpush.msrb.mxu3 %v424_v20  ;;  %v427_v36 = vld [vmem:[%s1318_s4 + $0xc0] sm:$0xff]  ;;  %v428_v37 = vld [vmem:[%s1318_s4 + $0xc8] sm:$0xff]  ;;  %v418_v39 = vld [vmem:[%s1318_s4 + $0x78] sm:$0xff] }
  0x18   : > { %577 = vmatpush.msrb.mxu1 %v451_v21  ;;  %557 = vmatpush.msrb.mxu0 %v450_v22  ;;  %v419_v38 = vld [vmem:[%s1318_s4 + $0x80] sm:$0xff]  ;;  %v420_v40 = vld [vmem:[%s1318_s4 + $0x88] sm:$0xff]  ;;  %v421_v41 = vld [vmem:[%s1318_s4 + $0x90] sm:$0xff] }
  0x19   : > { %597 = vmatpush.msrb.mxu2 %v452_v23  ;;  %620 = vmatpush.msrb.mxu3 %v417_v24  ;;  %v412_v42 = vld [vmem:[%s1318_s4 + $0x48] sm:$0xff]  ;;  %v411_v43 = vld [vmem:[%s1318_s4 + $0x40] sm:$0xff]  ;;  %v413_v44 = vld [vmem:[%s1318_s4 + $0x50] sm:$0xff] }
  0x1a   : > { %578 = vmatpush.msrb.mxu1 %v444_v25  ;;  %558 = vmatpush.msrb.mxu0 %v443_v26  ;;  %v414_v45 = vld [vmem:[%s1318_s4 + $0x58] sm:$0xff]  ;;  %v405_v46 = vld [vmem:[%s1318_s4 + $0x10] sm:$0xff]  ;;  %v404_v47 = vld [vmem:[%s1318_s4 + $0x8] sm:$0xff] }
  0x1b   : > { %598 = vmatpush.msrb.mxu2 %v445_v27  ;;  %621 = vmatpush.msrb.mxu3 %v410_v28  ;;  %v406_v48 = vld [vmem:[%s1318_s4 + $0x18] sm:$0xff]  ;;  %v407_v49 = vld [vmem:[%s1318_s4 + $0x20] sm:$0xff]  ;;  %v429_v51 = vld [vmem:[%s1318_s4 + $0xd0] sm:$0xff] }
  0x1c   : > { %579 = vmatpush.msrb.mxu1 %v437_v29  ;;  %559 = vmatpush.msrb.mxu0 %v436_v30  ;;  %v430_v50 = vld [vmem:[%s1318_s4 + $0xd8] sm:$0xff]  ;;  %v423_v52 = vld [vmem:[%s1318_s4 + $0xa0] sm:$0xff]  ;;  %v416_v54 = vld [vmem:[%s1318_s4 + $0x68] sm:$0xff] }
  0x1d   : > { %599 = vmatpush.msrb.mxu2 %v438_v31  ;;  %622 = vmatpush.msrb.mxu3 %v403_v32  ;;  %v422_v53 = vld [vmem:[%s1318_s4 + $0x98] sm:$0xff]  ;;  %v415_v55 = vld [vmem:[%s1318_s4 + $0x60] sm:$0xff]  ;;  %v409_v56 = vld [vmem:[%s1318_s4 + $0x30] sm:$0xff] }
  0x1e   : > { %986 = vmatmul.msk.f32.vlgmr.msrb.gmra.mxu0 %vm460_vm0, %v431_v16  ;;  %987 = vmatmul.msk.f32.vlgmr.msrb.gmra.mxu1 %vm460_vm0, %v431_v16  ;;  %v408_v57 = vld [vmem:[%s1318_s4 + $0x28] sm:$0xff]  ;;  %v747_v0 = vld [vmem:[%s1320_s6] sm:$0xff] }
  0x1f   : > { %988 = vmatmul.msk.f32.vlgmr.msrb.gmra.mxu2 %vm460_vm0, %v431_v16  ;;  %989 = vmatmul.msk.f32.vlgmr.msrb.gmra.mxu3 %vm460_vm0, %v402_v33  ;;  %v749_v1 = vperm.slane %v747_v0, 0  ;;  %v750_v5 = vperm.slane %v747_v0, 1  ;;  %v751_v6 = vperm.slane %v747_v0, 2  ;;  %v752_v17 = vperm.slane %v747_v0, 3 }
  0x20   : > { %659 = vmatpush.msra.mxu1 %v426_v34  ;;  %639 = vmatpush.msra.mxu0 %v425_v35  ;;  %v753_v18 = vperm.slane %v747_v0, 4  ;;  %v754_v21 = vperm.slane %v747_v0, 5  ;;  %v755_v24 = vperm.slane %v747_v0, 6 }
  0x21   : > { %679 = vmatpush.msra.mxu2 %v427_v36  ;;  %699 = vmatpush.msra.mxu3 %v428_v37 }
  0x22   : > { %660 = vmatpush.msra.mxu1 %v419_v38  ;;  %640 = vmatpush.msra.mxu0 %v418_v39 }
  0x23   : > { %680 = vmatpush.msra.mxu2 %v420_v40  ;;  %700 = vmatpush.msra.mxu3 %v421_v41  ;;  %v794_v40 = vld [vmem:[%s384_s25] sm:$0xff] }
  0x24   : > { %661 = vmatpush.msra.mxu1 %v412_v42  ;;  %641 = vmatpush.msra.mxu0 %v411_v43 }
  0x25   : > { %681 = vmatpush.msra.mxu2 %v413_v44  ;;  %701 = vmatpush.msra.mxu3 %v414_v45 }
  0x26   : > { %662 = vmatpush.msra.mxu1 %v405_v46  ;;  %642 = vmatpush.msra.mxu0 %v404_v47 }
  0x27   : > { %682 = vmatpush.msra.mxu2 %v406_v48  ;;  %702 = vmatpush.msra.mxu3 %v407_v49 }
  0x28   : > { %990 = vmatmul.msk.f32.vlgmr.msra.gmra.mxu0 %vm460_vm0, %v402_v33  ;;  %991 = vmatmul.msk.f32.vlgmr.msra.gmra.mxu1 %vm460_vm0, %v402_v33 }
  0x29   : > { %992 = vmatmul.msk.f32.vlgmr.msra.gmra.mxu2 %vm460_vm0, %v402_v33  ;;  %993 = vmatmul.msk.f32.vlgmr.msra.gmra.mxu3 %vm460_vm0, %v402_v33 }
  0x2a   : > { %739 = vmatpush.msrb.mxu1 %v430_v50  ;;  %719 = vmatpush.msrb.mxu0 %v429_v51 }
  0x2c   : > { %740 = vmatpush.msrb.mxu1 %v423_v52  ;;  %720 = vmatpush.msrb.mxu0 %v422_v53 }
  0x2e   : > { %741 = vmatpush.msrb.mxu1 %v416_v54  ;;  %721 = vmatpush.msrb.mxu0 %v415_v55 }
  0x30   : > { %742 = vmatpush.msrb.mxu1 %v409_v56  ;;  %722 = vmatpush.msrb.mxu0 %v408_v57  ;;  %v807_v56 = vld [vmem:[%s388_s15] sm:$0xff] }
  0x31   : > { %994 = vmatmul.msk.f32.vlgmr.msrb.gmra.mxu0 %vm460_vm0, %v402_v33  ;;  %995 = vmatmul.msk.f32.vlgmr.msrb.gmra.mxu1 %vm460_vm0, %v402_v33 }
  0x91   : > { %v481_v58 = vpop.f32.mrf.mxu0  ;;  %v501_v59 = vpop.f32.mrf.mxu1 }
  0x98   : > { %v521_v60 = vpop.f32.mrf.mxu2  ;;  %v541_v61 = vpop.f32.mrf.mxu3 }
  0x9b   : > { %v561_v62 = vpop.f32.mrf.mxu0  ;;  %v581_v63 = vpop.f32.mrf.mxu1 }
  0xa2   : > { %v601_v2 = vpop.f32.mrf.mxu2  ;;  %v624_v3 = vpop.f32.mrf.mxu3 }
  0xa3   : > { %v625_v4 = vadd.f32 %v624_v3, %v481_v58 }
  0xa5   : > { %v763_v7 = vadd.f32 %v749_v1, %v625_v4  ;;  %v644_v8 = vpop.f32.mrf.mxu0  ;;  %v664_v9 = vpop.f32.mrf.mxu1 }
  0xa6   : > { %v645_v10 = vadd.f32 %v644_v8, %v501_v59  ;;  %v665_v11 = vadd.f32 %v664_v9, %v521_v60 }
  0xa7   : > { %v796_v12 = vmul.f32 0.5, %v763_v7 }
  0xa8   : > { %v764_v13 = vadd.f32 %v750_v5, %v645_v10  ;;  %v765_v14 = vadd.f32 %v751_v6, %v665_v11 }
  0xa9   : > { %1007 = vtanh.f32 %v796_v12 }
  0xaa   : > { %v790_v15 = vmul.f32 0.5, %v764_v13  ;;  %v784_v16 = vmul.f32 0.5, %v765_v14 }
  0xac   : > { %1009 = vtanh.f32 %v790_v15  ;;  %v684_v19 = vpop.f32.mrf.mxu2  ;;  %v704_v20 = vpop.f32.mrf.mxu3 }
  0xad   : > { %1011 = vtanh.f32 %v784_v16  ;;  %v685_v22 = vadd.f32 %v684_v19, %v541_v61  ;;  %v705_v23 = vadd.f32 %v704_v20, %v561_v62 }
  0xae   : > { %v724_v25 = vpop.f32.mrf.mxu0  ;;  %v744_v26 = vpop.f32.mrf.mxu1 }
  0xaf   : > { %v1008_v27 = vpop.eup %1007  ;;  %v766_v28 = vadd.f32 %v752_v17, %v685_v22  ;;  %v767_v29 = vadd.f32 %v753_v18, %v705_v23  ;;  %v725_v30 = vadd.f32 %v724_v25, %v581_v63  ;;  %v745_v31 = vadd.f32 %v744_v26, %v601_v2 }
  0xb0   : > { %v798_v36 = vmul.f32 0.5, %v1008_v27 }
  0xb1   : > { %1013 = vtanh.f32 %v766_v28  ;;  %v809_v32 = vmul.f32 0.5, %v767_v29  ;;  %v768_v33 = vadd.f32 %v754_v21, %v725_v30  ;;  %v769_v34 = vadd.f32 %v755_v24, %v745_v31 }
  0xb2   : > { %v1010_v35 = vpop.eup %1009  ;;  %v799_v44 = vadd.f32 0.5, %v798_v36 }
  0xb3   : > { %v1012_v37 = vpop.eup %1011  ;;  %v792_v38 = vmul.f32 0.5, %v1010_v35  ;;  %1015 = vtanh.f32 %v809_v32  ;;  %v803_v39 = vmul.f32 0.5, %v768_v33  ;;  %v771_v42 = vmul.f32 1.442695, %v769_v34 }
  0xb4   : > { %v786_v41 = vmul.f32 0.5, %v1012_v37  ;;  %vm770_vm2 = vcmp.gt.f32.partialorder %v769_v34, 20.0 }
  0xb5   : > { %v793_v43 = vadd.f32 0.5, %v792_v38  ;;  %1017 = vtanh.f32 %v803_v39 }
  0xb6   : > { %v787_v45 = vadd.f32 0.5, %v786_v41  ;;  %1019 = vpow2.f32 %v771_v42 }
  0xb7   : > { %v1014_v46 = vpop.eup %1013  ;;  %v795_v47 = vmul.f32 %v794_v40, %v793_v43 }
  0xb8   : > { %788 = vst [vmem:[%s1295_s29 + $0x8] sm:$0xff] %v787_v45  ;;  %v800_v48 = vmul.f32 %v1014_v46, %v799_v44 }
  0xb9   : > { %v1016_v49 = vpop.eup %1015 }
  0xba   : > { %v801_v50 = vadd.f32 %v800_v48, %v795_v47  ;;  %v811_v51 = vmul.f32 0.5, %v1016_v49 }
  0xbb   : > { %v1018_v52 = vpop.eup %1017 }
  0xbc   : > { %v1020_v53 = vpop.eup %1019  ;;  %802 = vst [vmem:[%s392_s12] sm:$0xff] %v801_v50  ;;  %v812_v54 = vadd.f32 0.5, %v811_v51  ;;  %v805_v55 = vmul.f32 0.5, %v1018_v52 }
  0xbd   : > { %v773_v57 = vadd.f32 1.0, %v1020_v53  ;;  %v776_v59 = vmul.f32 -0.5, %v1020_v53  ;;  %v779_v0 = vand.u32 2147483647, %v1020_v53 }
  0xbe   : > { %v806_v58 = vadd.f32 0.5, %v805_v55  ;;  %v813_v60 = vmul.f32 %v1014_v46, %v812_v54 }
  0xbf   : > { %1021 = vlog2.f32 %v773_v57  ;;  %v777_v63 = vadd.f32 1.0, %v776_v59  ;;  %vm780_vm1 = vcmp.lt.f32.partialorder %v779_v0, 0.0004427343 }
  0xc0   : > { %v808_v61 = vmul.f32 %v807_v56, %v806_v58 }
  0xc1   : > { %v778_v3 = vmul.f32 %v1020_v53, %v777_v63 }
  0xc2   : > { %v814_v62 = vadd.f32 %v813_v60, %v808_v61 }
  0xc4   : > { %815 = vst [vmem:[%s396_s18] sm:$0xff] %v814_v62 }
  0xc5   : > { %v1022_v1 = vpop.eup %1021 }
  0xc6   : > { %v775_v2 = vmul.f32 0.6931472, %v1022_v1 }
  0xc8   : > { %v781_v4 = vsel %vm780_vm1, %v778_v3, %v775_v2 }
  0xc9   : > { %v782_v5 = vsel %vm770_vm2, %v769_v34, %v781_v4 }
  0xca   : > { %783 = vst [vmem:[%s1295_s29] sm:$0xff] %v782_v5 }
  0xcb PF: > { %s20_s30 = sadd.s32 1, %s1029_s30  }
  0xcc   : > { %p17_p4 = scmp.ge.s32.totalorder %s20_s30, 4  }
  0xce   :  { %19 = sbr.rel (!%p17_p4) target bundleno = 1 (0x1), region = 111 }

</bundles_post_ra>
